<compile_context>
chip_gen: v7x
topology: tpu7x:2x2x1
jax: 0.10.0
libtpu: 0.0.40
codegen_flags: <defaults>
</compile_context>

<pallas_src>
import functools

import jax
import jax.numpy as jnp
from jax.experimental import pallas as pl
from jax.experimental.pallas import tpu as pltpu

BN_EPS = 1e-5
LANE = 128

# order of the packed (1, N) vectors inside the single packed input array
VEC_ORDER = (
    "eb0", "eg0", "ebt0",          # encoder: Linear bias, BN gamma, BN beta
    "eb1", "eg1", "ebt1",
    "eb2",
    "bhead",                       # fused [bmu || blogvar]
    "db0", "dg0", "dbt0",          # decoder
    "db1", "dg1", "dbt1",
    "db2",
)


def _round_up(n, m):
    return (n + m - 1) // m * m


# --------------------------------------------------------------------------
# kernel
# --------------------------------------------------------------------------
def fc_vae_kernel(
    offsets,                       # static: {name: (lane_offset, width)}
    # inputs
    x_ref, eps_ref,
    ew0_ref, ew1_ref, ew2_ref, whead_ref,
    dw0_ref, dw1_ref, dw2_ref,
    vec_ref,                       # packed biases / BN params, (1, total) f32
    # outputs
    res_ref, zml_ref,              # zml = [z || mu || logvar], (B, 3*nz)
):
    def vec(name):
        off, n = offsets[name]
        return vec_ref[:, off:off + n]          # (1, n), lane-aligned static slice

    def linear(h, w_ref, bias_name):
        # bf16 operands, f32 accumulation on the MXU
        acc = jnp.dot(h.astype(jnp.bfloat16), w_ref[...],
                      preferred_element_type=jnp.float32)
        return acc + vec(bias_name)

    def batchnorm_train(h, gamma_name, beta_name):
        # one-pass batch statistics (training mode, biased variance)
        inv_b = 1.0 / h.shape[0]
        s1 = jnp.sum(h, axis=0, keepdims=True)
        s2 = jnp.sum(h * h, axis=0, keepdims=True)
        mean = s1 * inv_b
        var = jnp.maximum(s2 * inv_b - mean * mean, 0.0)
        return vec(gamma_name) * (h - mean) * jax.lax.rsqrt(var + BN_EPS) \
            + vec(beta_name)

    def relu(h):
        return jnp.maximum(h, 0.0)

    x = x_ref[...].astype(jnp.float32)

    # encoder: Linear -> ReLU -> BN -> Linear -> BN -> ReLU -> Linear
    h = relu(linear(x, ew0_ref, "eb0"))
    h = batchnorm_train(h, "eg0", "ebt0")
    h = batchnorm_train(linear(h, ew1_ref, "eb1"), "eg1", "ebt1")
    h = relu(h)
    h = linear(h, ew2_ref, "eb2")

    # fused latent heads: one matmul producing [mu || logvar]
    head = linear(h, whead_ref, "bhead")
    nz = head.shape[1] // 2
    mu = head[:, :nz]
    logvar = head[:, nz:]

    # reparametrize: z = eps * exp(0.5 * logvar) + mu  (f32)
    std = jnp.exp(0.5 * logvar)
    z = eps_ref[...].astype(jnp.float32) * std + mu

    # decoder: Linear -> ReLU -> BN -> Linear -> BN -> ReLU -> Linear
    d = relu(linear(z, dw0_ref, "db0"))
    d = batchnorm_train(d, "dg0", "dbt0")
    d = batchnorm_train(linear(d, dw1_ref, "db1"), "dg1", "dbt1")
    d = relu(d)
    d = linear(d, dw2_ref, "db2")

    res_ref[...] = d
    zml_ref[...] = jnp.concatenate([z, mu, logvar], axis=1)


# --------------------------------------------------------------------------
# parameter prep
# --------------------------------------------------------------------------
def make_params(key, n_input, n_hidden, nz):
    """Deterministic synthetic parameters mirroring nn.Linear / nn.BatchNorm1d
    defaults.  Linear weights stored as (in, out); vectors as (1, out), f32."""
    def linear(k, fan_in, fan_out):
        kw, kb = jax.random.split(k)
        scale = 1.0 / jnp.sqrt(jnp.float32(fan_in))
        w = jax.random.uniform(kw, (fan_in, fan_out), jnp.float32, -scale, scale)
        b = jax.random.uniform(kb, (1, fan_out), jnp.float32, -scale, scale)
        return w, b

    def bn(fan_out):
        return (jnp.ones((1, fan_out), jnp.float32),
                jnp.zeros((1, fan_out), jnp.float32))

    keys = jax.random.split(key, 8)
    p = {}
    p["ew0"], p["eb0"] = linear(keys[0], n_input, n_hidden)
    p["eg0"], p["ebt0"] = bn(n_hidden)
    p["ew1"], p["eb1"] = linear(keys[1], n_hidden, n_hidden)
    p["eg1"], p["ebt1"] = bn(n_hidden)
    p["ew2"], p["eb2"] = linear(keys[2], n_hidden, n_hidden)
    p["wmu"], p["bmu"] = linear(keys[3], n_hidden, nz)
    p["wlv"], p["blv"] = linear(keys[4], n_hidden, nz)
    p["dw0"], p["db0"] = linear(keys[5], nz, n_hidden)
    p["dg0"], p["dbt0"] = bn(n_hidden)
    p["dw1"], p["db1"] = linear(keys[6], n_hidden, n_hidden)
    p["dg1"], p["dbt1"] = bn(n_hidden)
    p["dw2"], p["db2"] = linear(keys[7], n_hidden, n_input)
    return p


def pack_params(p):
    """bf16 weights (with fused latent head) + one lane-aligned packed f32
    vector array + static offset table."""
    whead = jnp.concatenate([p["wmu"], p["wlv"]], axis=1)
    weights = [p["ew0"], p["ew1"], p["ew2"], whead, p["dw0"], p["dw1"], p["dw2"]]
    weights = [w.astype(jnp.bfloat16) for w in weights]

    vecs = dict(p)
    vecs["bhead"] = jnp.concatenate([p["bmu"], p["blv"]], axis=1)

    offsets = {}
    segments = []
    off = 0
    for name in VEC_ORDER:
        v = vecs[name].astype(jnp.float32)
        n = v.shape[1]
        offsets[name] = (off, n)
        padded = _round_up(n, LANE)
        segments.append(jnp.pad(v, ((0, 0), (0, padded - n))))
        off += padded
    packed_vecs = jnp.concatenate(segments, axis=1)
    return weights, packed_vecs, offsets


# --------------------------------------------------------------------------
# wrapper
# --------------------------------------------------------------------------
def fc_vae_forward(x, eps, params):
    B, n_input = x.shape
    nz = eps.shape[1]

    weights, packed_vecs, offsets = pack_params(params)
    inputs = [x.astype(jnp.float32), eps.astype(jnp.float32)] + weights \
        + [packed_vecs]

    out_shape = (
        jax.ShapeDtypeStruct((B, n_input), jnp.float32),   # res
        jax.ShapeDtypeStruct((B, 3 * nz), jnp.float32),    # [z || mu || logvar]
    )

    vmem_spec = pl.BlockSpec(memory_space=pltpu.MemorySpace.VMEM)

    # explicit scoped-VMEM budget (v5e default is only 16 MiB; v7x physical 64 MiB)
    io_bytes = sum(int(a.size) * a.dtype.itemsize for a in inputs)
    io_bytes += (B * n_input + B * 3 * nz) * 4
    vmem_limit = int(min(max(2 * io_bytes + (4 << 20), 16 << 20), 48 << 20))

    kernel = functools.partial(fc_vae_kernel, offsets)
    res, zml = pl.pallas_call(
        kernel,
        out_shape=out_shape,
        in_specs=[vmem_spec] * len(inputs),
        out_specs=tuple(vmem_spec for _ in out_shape),
        compiler_params=pltpu.CompilerParams(vmem_limit_bytes=vmem_limit),
    )(*inputs)

    z = zml[:, :nz]
    mu = zml[:, nz:2 * nz]
    logvar = zml[:, 2 * nz:]
    return res, z, mu, logvar


# --------------------------------------------------------------------------
# pure-JAX reference (mirrors the kernel's bf16-matmul / f32-elementwise math)
# --------------------------------------------------------------------------
def fc_vae_reference(x, eps, p):
    def lin(h, w, b):
        return jnp.dot(h.astype(jnp.bfloat16), w.astype(jnp.bfloat16),
                       preferred_element_type=jnp.float32) + b

    def bn(h, g, bt):
        m = jnp.mean(h, axis=0, keepdims=True)
        v = jnp.maximum(jnp.mean(h * h, axis=0, keepdims=True) - m * m, 0.0)
        return g * (h - m) * jax.lax.rsqrt(v + BN_EPS) + bt

    relu = lambda h: jnp.maximum(h, 0.0)

    h = relu(lin(x, p["ew0"], p["eb0"]))
    h = bn(h, p["eg0"], p["ebt0"])
    h = bn(lin(h, p["ew1"], p["eb1"]), p["eg1"], p["ebt1"])
    h = relu(h)
    h = lin(h, p["ew2"], p["eb2"])
    mu = lin(h, p["wmu"], p["bmu"])
    logvar = lin(h, p["wlv"], p["blv"])
    z = eps * jnp.exp(0.5 * logvar) + mu
    d = relu(lin(z, p["dw0"], p["db0"]))
    d = bn(d, p["dg0"], p["dbt0"])
    d = bn(lin(d, p["dw1"], p["db1"]), p["dg1"], p["dbt1"])
    d = relu(d)
    d = lin(d, p["dw2"], p["db2"])
    return d, z, mu, logvar


if __name__ == "__main__":
    batch, n_input, n_hidden, nz = 8, 16, 32, 8

    key = jax.random.PRNGKey(0)
    kx, keps, kparams = jax.random.split(key, 3)
    x = jax.random.normal(kx, (batch, n_input), jnp.float32)
    eps = jax.random.normal(keps, (batch, nz), jnp.float32)  # reparam noise
    params = make_params(kparams, n_input, n_hidden, nz)

    res, z, mu, logvar = jax.block_until_ready(fc_vae_forward(x, eps, params))

    # sanity-check against a pure-JAX reference using the same bf16-matmul math
    r_res, r_z, r_mu, r_lv = fc_vae_reference(x, eps, params)
    for got, want in ((res, r_res), (z, r_z), (mu, r_mu), (logvar, r_lv)):
        assert got.shape == want.shape
        assert jnp.allclose(got, want, rtol=1e-2, atol=1e-2), "mismatch vs reference"

    print("KERNEL_OK")
</pallas_src>

<mosaic_0001>
module attributes {stable_mosaic.version = 11 : i64} {
  func.func @fc_vae_kernel(%arg0: memref<8x16xf32, #tpu.memory_space<vmem>>, %arg1: memref<8x8xf32, #tpu.memory_space<vmem>>, %arg2: memref<16x32xbf16, #tpu.memory_space<vmem>>, %arg3: memref<32x32xbf16, #tpu.memory_space<vmem>>, %arg4: memref<32x32xbf16, #tpu.memory_space<vmem>>, %arg5: memref<32x16xbf16, #tpu.memory_space<vmem>>, %arg6: memref<8x32xbf16, #tpu.memory_space<vmem>>, %arg7: memref<32x32xbf16, #tpu.memory_space<vmem>>, %arg8: memref<32x16xbf16, #tpu.memory_space<vmem>>, %arg9: memref<1x1920xf32, #tpu.memory_space<vmem>>, %arg10: memref<8x16xf32, #tpu.memory_space<vmem>>, %arg11: memref<8x24xf32, #tpu.memory_space<vmem>>) attributes {dimension_semantics = [], scalar_prefetch = 0 : i64, scratch_operands = 0 : i64, tpu.core_type = #tpu.core_type<tc>} {
    %c0 = arith.constant 0 : index
    %c0_0 = arith.constant 0 : index
    %0 = vector.load %arg0[%c0, %c0_0] : memref<8x16xf32, #tpu.memory_space<vmem>>, vector<8x16xf32>
    %1 = arith.truncf %0 : vector<8x16xf32> to vector<8x16xbf16>
    %c0_1 = arith.constant 0 : index
    %c0_2 = arith.constant 0 : index
    %2 = vector.load %arg2[%c0_1, %c0_2] : memref<16x32xbf16, #tpu.memory_space<vmem>>, vector<16x32xbf16>
    %cst = arith.constant dense<0.000000e+00> : vector<8x32xf32>
    %3 = tpu.matmul %1, %2, %cst {dimension_numbers = #tpu.dot_dimension_numbers<[1], [0], [0], [1], [0, 0, 1, 1], [], []>} : vector<8x16xbf16>, vector<16x32xbf16>, vector<8x32xf32> -> vector<8x32xf32>
    %c0_3 = arith.constant 0 : index
    %c0_4 = arith.constant 0 : index
    %4 = vector.load %arg9[%c0_3, %c0_4] : memref<1x1920xf32, #tpu.memory_space<vmem>>, vector<1x32xf32>
    %5 = vector.broadcast %4 : vector<1x32xf32> to vector<8x32xf32>
    %6 = arith.addf %3, %5 : vector<8x32xf32>
    %cst_5 = arith.constant 0.000000e+00 : f32
    %7 = vector.broadcast %cst_5 : f32 to vector<8x32xf32>
    %8 = arith.maximumf %6, %7 : vector<8x32xf32>
    %cst_6 = arith.constant dense<0.000000e+00> : vector<32xf32>
    %9 = vector.multi_reduction <add>, %8, %cst_6 [0] : vector<8x32xf32> to vector<32xf32>
    %10 = vector.shape_cast %9 : vector<32xf32> to vector<1x32xf32>
    %11 = arith.mulf %8, %8 : vector<8x32xf32>
    %cst_7 = arith.constant dense<0.000000e+00> : vector<32xf32>
    %12 = vector.multi_reduction <add>, %11, %cst_7 [0] : vector<8x32xf32> to vector<32xf32>
    %13 = vector.shape_cast %12 : vector<32xf32> to vector<1x32xf32>
    %cst_8 = arith.constant 1.250000e-01 : f32
    %14 = vector.broadcast %cst_8 : f32 to vector<1x32xf32>
    %15 = arith.mulf %10, %14 : vector<1x32xf32>
    %cst_9 = arith.constant 1.250000e-01 : f32
    %16 = vector.broadcast %cst_9 : f32 to vector<1x32xf32>
    %17 = arith.mulf %13, %16 : vector<1x32xf32>
    %18 = arith.mulf %15, %15 : vector<1x32xf32>
    %19 = arith.subf %17, %18 : vector<1x32xf32>
    %cst_10 = arith.constant 0.000000e+00 : f32
    %20 = vector.broadcast %cst_10 : f32 to vector<1x32xf32>
    %21 = arith.maximumf %19, %20 : vector<1x32xf32>
    %c0_11 = arith.constant 0 : index
    %c128 = arith.constant 128 : index
    %22 = vector.load %arg9[%c0_11, %c128] : memref<1x1920xf32, #tpu.memory_space<vmem>>, vector<1x32xf32>
    %23 = vector.broadcast %15 : vector<1x32xf32> to vector<8x32xf32>
    %24 = arith.subf %8, %23 : vector<8x32xf32>
    %25 = vector.broadcast %22 : vector<1x32xf32> to vector<8x32xf32>
    %26 = arith.mulf %25, %24 : vector<8x32xf32>
    %cst_12 = arith.constant 9.99999974E-6 : f32
    %27 = vector.broadcast %cst_12 : f32 to vector<1x32xf32>
    %28 = arith.addf %21, %27 : vector<1x32xf32>
    %29 = math.rsqrt %28 : vector<1x32xf32>
    %30 = vector.broadcast %29 : vector<1x32xf32> to vector<8x32xf32>
    %31 = arith.mulf %26, %30 : vector<8x32xf32>
    %c0_13 = arith.constant 0 : index
    %c256 = arith.constant 256 : index
    %32 = vector.load %arg9[%c0_13, %c256] : memref<1x1920xf32, #tpu.memory_space<vmem>>, vector<1x32xf32>
    %33 = vector.broadcast %32 : vector<1x32xf32> to vector<8x32xf32>
    %34 = arith.addf %31, %33 : vector<8x32xf32>
    %35 = arith.truncf %34 : vector<8x32xf32> to vector<8x32xbf16>
    %c0_14 = arith.constant 0 : index
    %c0_15 = arith.constant 0 : index
    %36 = vector.load %arg3[%c0_14, %c0_15] : memref<32x32xbf16, #tpu.memory_space<vmem>>, vector<32x32xbf16>
    %cst_16 = arith.constant dense<0.000000e+00> : vector<8x32xf32>
    %37 = tpu.matmul %35, %36, %cst_16 {dimension_numbers = #tpu.dot_dimension_numbers<[1], [0], [0], [1], [0, 0, 1, 1], [], []>} : vector<8x32xbf16>, vector<32x32xbf16>, vector<8x32xf32> -> vector<8x32xf32>
    %c0_17 = arith.constant 0 : index
    %c384 = arith.constant 384 : index
    %38 = vector.load %arg9[%c0_17, %c384] : memref<1x1920xf32, #tpu.memory_space<vmem>>, vector<1x32xf32>
    %39 = vector.broadcast %38 : vector<1x32xf32> to vector<8x32xf32>
    %40 = arith.addf %37, %39 : vector<8x32xf32>
    %cst_18 = arith.constant dense<0.000000e+00> : vector<32xf32>
    %41 = vector.multi_reduction <add>, %40, %cst_18 [0] : vector<8x32xf32> to vector<32xf32>
    %42 = vector.shape_cast %41 : vector<32xf32> to vector<1x32xf32>
    %43 = arith.mulf %40, %40 : vector<8x32xf32>
    %cst_19 = arith.constant dense<0.000000e+00> : vector<32xf32>
    %44 = vector.multi_reduction <add>, %43, %cst_19 [0] : vector<8x32xf32> to vector<32xf32>
    %45 = vector.shape_cast %44 : vector<32xf32> to vector<1x32xf32>
    %cst_20 = arith.constant 1.250000e-01 : f32
    %46 = vector.broadcast %cst_20 : f32 to vector<1x32xf32>
    %47 = arith.mulf %42, %46 : vector<1x32xf32>
    %cst_21 = arith.constant 1.250000e-01 : f32
    %48 = vector.broadcast %cst_21 : f32 to vector<1x32xf32>
    %49 = arith.mulf %45, %48 : vector<1x32xf32>
    %50 = arith.mulf %47, %47 : vector<1x32xf32>
    %51 = arith.subf %49, %50 : vector<1x32xf32>
    %cst_22 = arith.constant 0.000000e+00 : f32
    %52 = vector.broadcast %cst_22 : f32 to vector<1x32xf32>
    %53 = arith.maximumf %51, %52 : vector<1x32xf32>
    %c0_23 = arith.constant 0 : index
    %c512 = arith.constant 512 : index
    %54 = vector.load %arg9[%c0_23, %c512] : memref<1x1920xf32, #tpu.memory_space<vmem>>, vector<1x32xf32>
    %55 = vector.broadcast %47 : vector<1x32xf32> to vector<8x32xf32>
    %56 = arith.subf %40, %55 : vector<8x32xf32>
    %57 = vector.broadcast %54 : vector<1x32xf32> to vector<8x32xf32>
    %58 = arith.mulf %57, %56 : vector<8x32xf32>
    %cst_24 = arith.constant 9.99999974E-6 : f32
    %59 = vector.broadcast %cst_24 : f32 to vector<1x32xf32>
    %60 = arith.addf %53, %59 : vector<1x32xf32>
    %61 = math.rsqrt %60 : vector<1x32xf32>
    %62 = vector.broadcast %61 : vector<1x32xf32> to vector<8x32xf32>
    %63 = arith.mulf %58, %62 : vector<8x32xf32>
    %c0_25 = arith.constant 0 : index
    %c640 = arith.constant 640 : index
    %64 = vector.load %arg9[%c0_25, %c640] : memref<1x1920xf32, #tpu.memory_space<vmem>>, vector<1x32xf32>
    %65 = vector.broadcast %64 : vector<1x32xf32> to vector<8x32xf32>
    %66 = arith.addf %63, %65 : vector<8x32xf32>
    %cst_26 = arith.constant 0.000000e+00 : f32
    %67 = vector.broadcast %cst_26 : f32 to vector<8x32xf32>
    %68 = arith.maximumf %66, %67 : vector<8x32xf32>
    %69 = arith.truncf %68 : vector<8x32xf32> to vector<8x32xbf16>
    %c0_27 = arith.constant 0 : index
    %c0_28 = arith.constant 0 : index
    %70 = vector.load %arg4[%c0_27, %c0_28] : memref<32x32xbf16, #tpu.memory_space<vmem>>, vector<32x32xbf16>
    %cst_29 = arith.constant dense<0.000000e+00> : vector<8x32xf32>
    %71 = tpu.matmul %69, %70, %cst_29 {dimension_numbers = #tpu.dot_dimension_numbers<[1], [0], [0], [1], [0, 0, 1, 1], [], []>} : vector<8x32xbf16>, vector<32x32xbf16>, vector<8x32xf32> -> vector<8x32xf32>
    %c0_30 = arith.constant 0 : index
    %c768 = arith.constant 768 : index
    %72 = vector.load %arg9[%c0_30, %c768] : memref<1x1920xf32, #tpu.memory_space<vmem>>, vector<1x32xf32>
    %73 = vector.broadcast %72 : vector<1x32xf32> to vector<8x32xf32>
    %74 = arith.addf %71, %73 : vector<8x32xf32>
    %75 = arith.truncf %74 : vector<8x32xf32> to vector<8x32xbf16>
    %c0_31 = arith.constant 0 : index
    %c0_32 = arith.constant 0 : index
    %76 = vector.load %arg5[%c0_31, %c0_32] : memref<32x16xbf16, #tpu.memory_space<vmem>>, vector<32x16xbf16>
    %cst_33 = arith.constant dense<0.000000e+00> : vector<8x16xf32>
    %77 = tpu.matmul %75, %76, %cst_33 {dimension_numbers = #tpu.dot_dimension_numbers<[1], [0], [0], [1], [0, 0, 1, 1], [], []>} : vector<8x32xbf16>, vector<32x16xbf16>, vector<8x16xf32> -> vector<8x16xf32>
    %c0_34 = arith.constant 0 : index
    %c896 = arith.constant 896 : index
    %78 = vector.load %arg9[%c0_34, %c896] : memref<1x1920xf32, #tpu.memory_space<vmem>>, vector<1x16xf32>
    %79 = vector.broadcast %78 : vector<1x16xf32> to vector<8x16xf32>
    %80 = arith.addf %77, %79 : vector<8x16xf32>
    %81 = vector.extract_strided_slice %80 {offsets = [0, 0], sizes = [8, 8], strides = [1, 1]} : vector<8x16xf32> to vector<8x8xf32>
    %82 = vector.extract_strided_slice %80 {offsets = [0, 8], sizes = [8, 8], strides = [1, 1]} : vector<8x16xf32> to vector<8x8xf32>
    %cst_35 = arith.constant 5.000000e-01 : f32
    %83 = vector.broadcast %cst_35 : f32 to vector<8x8xf32>
    %84 = arith.mulf %83, %82 : vector<8x8xf32>
    %85 = math.exp %84 : vector<8x8xf32>
    %c0_36 = arith.constant 0 : index
    %c0_37 = arith.constant 0 : index
    %86 = vector.load %arg1[%c0_36, %c0_37] : memref<8x8xf32, #tpu.memory_space<vmem>>, vector<8x8xf32>
    %87 = arith.mulf %86, %85 : vector<8x8xf32>
    %88 = arith.addf %87, %81 : vector<8x8xf32>
    %89 = arith.truncf %88 : vector<8x8xf32> to vector<8x8xbf16>
    %c0_38 = arith.constant 0 : index
    %c0_39 = arith.constant 0 : index
    %90 = vector.load %arg6[%c0_38, %c0_39] : memref<8x32xbf16, #tpu.memory_space<vmem>>, vector<8x32xbf16>
    %cst_40 = arith.constant dense<0.000000e+00> : vector<8x32xf32>
    %91 = tpu.matmul %89, %90, %cst_40 {dimension_numbers = #tpu.dot_dimension_numbers<[1], [0], [0], [1], [0, 0, 1, 1], [], []>} : vector<8x8xbf16>, vector<8x32xbf16>, vector<8x32xf32> -> vector<8x32xf32>
    %c0_41 = arith.constant 0 : index
    %c1024 = arith.constant 1024 : index
    %92 = vector.load %arg9[%c0_41, %c1024] : memref<1x1920xf32, #tpu.memory_space<vmem>>, vector<1x32xf32>
    %93 = vector.broadcast %92 : vector<1x32xf32> to vector<8x32xf32>
    %94 = arith.addf %91, %93 : vector<8x32xf32>
    %cst_42 = arith.constant 0.000000e+00 : f32
    %95 = vector.broadcast %cst_42 : f32 to vector<8x32xf32>
    %96 = arith.maximumf %94, %95 : vector<8x32xf32>
    %cst_43 = arith.constant dense<0.000000e+00> : vector<32xf32>
    %97 = vector.multi_reduction <add>, %96, %cst_43 [0] : vector<8x32xf32> to vector<32xf32>
    %98 = vector.shape_cast %97 : vector<32xf32> to vector<1x32xf32>
    %99 = arith.mulf %96, %96 : vector<8x32xf32>
    %cst_44 = arith.constant dense<0.000000e+00> : vector<32xf32>
    %100 = vector.multi_reduction <add>, %99, %cst_44 [0] : vector<8x32xf32> to vector<32xf32>
    %101 = vector.shape_cast %100 : vector<32xf32> to vector<1x32xf32>
    %cst_45 = arith.constant 1.250000e-01 : f32
    %102 = vector.broadcast %cst_45 : f32 to vector<1x32xf32>
    %103 = arith.mulf %98, %102 : vector<1x32xf32>
    %cst_46 = arith.constant 1.250000e-01 : f32
    %104 = vector.broadcast %cst_46 : f32 to vector<1x32xf32>
    %105 = arith.mulf %101, %104 : vector<1x32xf32>
    %106 = arith.mulf %103, %103 : vector<1x32xf32>
    %107 = arith.subf %105, %106 : vector<1x32xf32>
    %cst_47 = arith.constant 0.000000e+00 : f32
    %108 = vector.broadcast %cst_47 : f32 to vector<1x32xf32>
    %109 = arith.maximumf %107, %108 : vector<1x32xf32>
    %c0_48 = arith.constant 0 : index
    %c1152 = arith.constant 1152 : index
    %110 = vector.load %arg9[%c0_48, %c1152] : memref<1x1920xf32, #tpu.memory_space<vmem>>, vector<1x32xf32>
    %111 = vector.broadcast %103 : vector<1x32xf32> to vector<8x32xf32>
    %112 = arith.subf %96, %111 : vector<8x32xf32>
    %113 = vector.broadcast %110 : vector<1x32xf32> to vector<8x32xf32>
    %114 = arith.mulf %113, %112 : vector<8x32xf32>
    %cst_49 = arith.constant 9.99999974E-6 : f32
    %115 = vector.broadcast %cst_49 : f32 to vector<1x32xf32>
    %116 = arith.addf %109, %115 : vector<1x32xf32>
    %117 = math.rsqrt %116 : vector<1x32xf32>
    %118 = vector.broadcast %117 : vector<1x32xf32> to vector<8x32xf32>
    %119 = arith.mulf %114, %118 : vector<8x32xf32>
    %c0_50 = arith.constant 0 : index
    %c1280 = arith.constant 1280 : index
    %120 = vector.load %arg9[%c0_50, %c1280] : memref<1x1920xf32, #tpu.memory_space<vmem>>, vector<1x32xf32>
    %121 = vector.broadcast %120 : vector<1x32xf32> to vector<8x32xf32>
    %122 = arith.addf %119, %121 : vector<8x32xf32>
    %123 = arith.truncf %122 : vector<8x32xf32> to vector<8x32xbf16>
    %c0_51 = arith.constant 0 : index
    %c0_52 = arith.constant 0 : index
    %124 = vector.load %arg7[%c0_51, %c0_52] : memref<32x32xbf16, #tpu.memory_space<vmem>>, vector<32x32xbf16>
    %cst_53 = arith.constant dense<0.000000e+00> : vector<8x32xf32>
    %125 = tpu.matmul %123, %124, %cst_53 {dimension_numbers = #tpu.dot_dimension_numbers<[1], [0], [0], [1], [0, 0, 1, 1], [], []>} : vector<8x32xbf16>, vector<32x32xbf16>, vector<8x32xf32> -> vector<8x32xf32>
    %c0_54 = arith.constant 0 : index
    %c1408 = arith.constant 1408 : index
    %126 = vector.load %arg9[%c0_54, %c1408] : memref<1x1920xf32, #tpu.memory_space<vmem>>, vector<1x32xf32>
    %127 = vector.broadcast %126 : vector<1x32xf32> to vector<8x32xf32>
    %128 = arith.addf %125, %127 : vector<8x32xf32>
    %cst_55 = arith.constant dense<0.000000e+00> : vector<32xf32>
    %129 = vector.multi_reduction <add>, %128, %cst_55 [0] : vector<8x32xf32> to vector<32xf32>
    %130 = vector.shape_cast %129 : vector<32xf32> to vector<1x32xf32>
    %131 = arith.mulf %128, %128 : vector<8x32xf32>
    %cst_56 = arith.constant dense<0.000000e+00> : vector<32xf32>
    %132 = vector.multi_reduction <add>, %131, %cst_56 [0] : vector<8x32xf32> to vector<32xf32>
    %133 = vector.shape_cast %132 : vector<32xf32> to vector<1x32xf32>
    %cst_57 = arith.constant 1.250000e-01 : f32
    %134 = vector.broadcast %cst_57 : f32 to vector<1x32xf32>
    %135 = arith.mulf %130, %134 : vector<1x32xf32>
    %cst_58 = arith.constant 1.250000e-01 : f32
    %136 = vector.broadcast %cst_58 : f32 to vector<1x32xf32>
    %137 = arith.mulf %133, %136 : vector<1x32xf32>
    %138 = arith.mulf %135, %135 : vector<1x32xf32>
    %139 = arith.subf %137, %138 : vector<1x32xf32>
    %cst_59 = arith.constant 0.000000e+00 : f32
    %140 = vector.broadcast %cst_59 : f32 to vector<1x32xf32>
    %141 = arith.maximumf %139, %140 : vector<1x32xf32>
    %c0_60 = arith.constant 0 : index
    %c1536 = arith.constant 1536 : index
    %142 = vector.load %arg9[%c0_60, %c1536] : memref<1x1920xf32, #tpu.memory_space<vmem>>, vector<1x32xf32>
    %143 = vector.broadcast %135 : vector<1x32xf32> to vector<8x32xf32>
    %144 = arith.subf %128, %143 : vector<8x32xf32>
    %145 = vector.broadcast %142 : vector<1x32xf32> to vector<8x32xf32>
    %146 = arith.mulf %145, %144 : vector<8x32xf32>
    %cst_61 = arith.constant 9.99999974E-6 : f32
    %147 = vector.broadcast %cst_61 : f32 to vector<1x32xf32>
    %148 = arith.addf %141, %147 : vector<1x32xf32>
    %149 = math.rsqrt %148 : vector<1x32xf32>
    %150 = vector.broadcast %149 : vector<1x32xf32> to vector<8x32xf32>
    %151 = arith.mulf %146, %150 : vector<8x32xf32>
    %c0_62 = arith.constant 0 : index
    %c1664 = arith.constant 1664 : index
    %152 = vector.load %arg9[%c0_62, %c1664] : memref<1x1920xf32, #tpu.memory_space<vmem>>, vector<1x32xf32>
    %153 = vector.broadcast %152 : vector<1x32xf32> to vector<8x32xf32>
    %154 = arith.addf %151, %153 : vector<8x32xf32>
    %cst_63 = arith.constant 0.000000e+00 : f32
    %155 = vector.broadcast %cst_63 : f32 to vector<8x32xf32>
    %156 = arith.maximumf %154, %155 : vector<8x32xf32>
    %157 = arith.truncf %156 : vector<8x32xf32> to vector<8x32xbf16>
    %c0_64 = arith.constant 0 : index
    %c0_65 = arith.constant 0 : index
    %158 = vector.load %arg8[%c0_64, %c0_65] : memref<32x16xbf16, #tpu.memory_space<vmem>>, vector<32x16xbf16>
    %cst_66 = arith.constant dense<0.000000e+00> : vector<8x16xf32>
    %159 = tpu.matmul %157, %158, %cst_66 {dimension_numbers = #tpu.dot_dimension_numbers<[1], [0], [0], [1], [0, 0, 1, 1], [], []>} : vector<8x32xbf16>, vector<32x16xbf16>, vector<8x16xf32> -> vector<8x16xf32>
    %c0_67 = arith.constant 0 : index
    %c1792 = arith.constant 1792 : index
    %160 = vector.load %arg9[%c0_67, %c1792] : memref<1x1920xf32, #tpu.memory_space<vmem>>, vector<1x16xf32>
    %161 = vector.broadcast %160 : vector<1x16xf32> to vector<8x16xf32>
    %162 = arith.addf %159, %161 : vector<8x16xf32>
    %c0_68 = arith.constant 0 : index
    %c0_69 = arith.constant 0 : index
    %163 = vector.load %arg10[%c0_68, %c0_69] : memref<8x16xf32, #tpu.memory_space<vmem>>, vector<8x16xf32>
    tpu.vector_store %arg10[%c0_68, %c0_69], %162 {strides = array<i32>} : memref<8x16xf32, #tpu.memory_space<vmem>>, vector<8x16xf32>,
    %164 = tpu.concatenate %88, %81, %82 in 1 : vector<8x8xf32>, vector<8x8xf32>, vector<8x8xf32> -> vector<8x24xf32>
    %c0_70 = arith.constant 0 : index
    %c0_71 = arith.constant 0 : index
    %165 = vector.load %arg11[%c0_70, %c0_71] : memref<8x24xf32, #tpu.memory_space<vmem>>, vector<8x24xf32>
    tpu.vector_store %arg11[%c0_70, %c0_71], %164 {strides = array<i32>} : memref<8x24xf32, #tpu.memory_space<vmem>>, vector<8x24xf32>,
    return
  }
}

</mosaic_0001>

<bundles_post_ra>
// kernel: tpu_custom_call.1
= control target key start
LH: loop header
LB: loop body
LE: loop exit
PB: predicated region body
PF: predicated region fallthrough
CT: control target
= control target key end

     0   :  { %17 = vsyncpa [#allocation3], 0  ;;  %s1297_s0 = inlined_call_operand.hbm [shape: f32[8,16], index: 0, kind: input, shape index: {}]   ;;  %s1298_s1 = inlined_call_operand.hbm [shape: f32[8,8], index: 1, kind: input, shape index: {}]   ;;  %s1299_s2 = inlined_call_operand.hbm [shape: bf16[16,32], index: 2, kind: input, shape index: {}]   ;;  %s1300_s3 = inlined_call_operand.vmem [shape: bf16[32,32], index: 3, kind: input, shape index: {}]   ;;  %s1301_s4 = inlined_call_operand.vmem [shape: bf16[32,32], index: 4, kind: input, shape index: {}]   ;;  %s1302_s5 = inlined_call_operand.vmem [shape: bf16[32,16], index: 5, kind: input, shape index: {}]   ;;  %s1303_s6 = inlined_call_operand.hbm [shape: bf16[8,32], index: 6, kind: input, shape index: {}]   ;;  %s1304_s7 = inlined_call_operand.vmem [shape: bf16[32,32], index: 7, kind: input, shape index: {}]   ;;  %s1305_s8 = inlined_call_operand.vmem [shape: bf16[32,16], index: 8, kind: input, shape index: {}]   ;;  %s1306_s9 = inlined_call_operand.vmem [shape: f32[1,1920], index: 9, kind: input, shape index: {}]   ;;  %s1307_s10 = inlined_call_operand.hbm [shape: f32[8,16], index: 10, kind: output, shape index: {0}]   ;;  %s1308_s11 = inlined_call_operand.hbm [shape: f32[8,24], index: 11, kind: output, shape index: {1}]  }
   0x1   :  { %18 = vsyncpa [#allocation6], 0 }
   0x2   :  { %19 = vsyncpa [#allocation9], 0 }
   0x3   :  { %20 = vsyncpa [#allocation4], 0 }
   0x4   :  { %21 = vsyncpa [#allocation12], 0  ;;  %s1036_s17 = smov [#allocation5]   ;;  %s1037_s19 = smov [#allocation2]  }
   0x5   :  { %s38_s18 = sshll.u32 %s1036_s17, 4  ;;  %s28_s20 = sshll.u32 %s1037_s19, 4  ;;  %s39_s18 = int_to_ptr.vmem [resolvable:$true] %s38_s18  ;;  %s29_s20 = int_to_ptr.vmem [resolvable:$true] %s28_s20 }
   0x6   :  { %s894_s23 = scalar_lea.hbm %s1298_s1, 128 }
   0x7   :  { %p895_p0 = scmp.ne.s32.totalorder %s1298_s1, %s894_s23  ;;  %p898_p1 = scmp.lt.u32.totalorder %s894_s23, %s1298_s1 }
   0x9   :  { %p900_p2 = pnand %p898_p1, %p895_p0 }
   0xb   :  { %903 = shalt.err (!%p900_p2)
}
   0xc   :  { %s904_s28 = scalar_lea.vmem %s39_s18, 128  ;;  %p909_p4 = scmp.lt.s32.totalorder %s39_s18, %s39_s18 }
   0xd   :  { %p905_p3 = scmp.ne.s32.totalorder %s39_s18, %s904_s28  ;;  %p910_p5 = scmp.lt.s32.totalorder %s904_s28, %s904_s28 }
   0xf   :  { %p911_p6 = por %p910_p5, %p909_p4 }
  0x11   :  { %p912_p7 = pnand %p911_p6, %p905_p3 }
  0x13   :  { %915 = shalt.err (!%p912_p7)
}
  0x14   :  { %41 = dma.hbm_to_vmem [thread:$0]  %s1298_s1, 128, %s39_s18, [#allocation6]  }
  0x15   :  { %s916_s14 = scalar_lea.hbm %s1297_s0, 128 }
  0x16   :  { %p917_p8 = scmp.ne.s32.totalorder %s1297_s0, %s916_s14  ;;  %p920_p9 = scmp.lt.u32.totalorder %s916_s14, %s1297_s0 }
  0x18   :  { %p922_p10 = pnand %p920_p9, %p917_p8 }
  0x1a   :  { %925 = shalt.err (!%p922_p10)
}
  0x1b   :  { %s926_s21 = scalar_lea.vmem %s29_s20, 128  ;;  %p931_p12 = scmp.lt.s32.totalorder %s29_s20, %s29_s20 }
  0x1c   :  { %p927_p11 = scmp.ne.s32.totalorder %s29_s20, %s926_s21  ;;  %p932_p13 = scmp.lt.s32.totalorder %s926_s21, %s926_s21 }
  0x1e   :  { %p933_p0 = por %p932_p13, %p931_p12 }
  0x20   :  { %p934_p1 = pnand %p933_p0, %p927_p11 }
  0x22   :  { %937 = shalt.err (!%p934_p1)
}
  0x23   :  { %31 = dma.hbm_to_vmem [thread:$0]  %s1297_s0, 128, %s29_s20, [#allocation3]  }
  0x24   :  { %s1038_s22 = smov [#allocation7]   ;;  %s938_s26 = scalar_lea.hbm %s1299_s2, 128 }
  0x25   :  { %s47_s23 = sshll.u32 %s1038_s22, 4  ;;  %p939_p2 = scmp.ne.s32.totalorder %s1299_s2, %s938_s26  ;;  %s48_s23 = int_to_ptr.vmem [resolvable:$true] %s47_s23 }
  0x26   :  { %p942_p3 = scmp.lt.u32.totalorder %s938_s26, %s1299_s2 }
  0x28   :  { %p944_p4 = pnand %p942_p3, %p939_p2 }
  0x2a   :  { %947 = shalt.err (!%p944_p4)
}
  0x2b   :  { %s948_s12 = scalar_lea.vmem %s48_s23, 128  ;;  %p953_p6 = scmp.lt.s32.totalorder %s48_s23, %s48_s23 }
  0x2c   :  { %p949_p5 = scmp.ne.s32.totalorder %s48_s23, %s948_s12  ;;  %p954_p7 = scmp.lt.s32.totalorder %s948_s12, %s948_s12 }
  0x2e   :  { %p955_p8 = por %p954_p7, %p953_p6 }
  0x30   :  { %p956_p9 = pnand %p955_p8, %p949_p5 }
  0x32   :  { %959 = shalt.err (!%p956_p9)
}
  0x33   :  { %s1039_s0 = smov 64   ;;  %s1040_s20 = smov 4  }
  0x34   :  { %53 = dma.hbm_to_vmem [thread:$0]  %s1299_s2, 128, %s48_s23, [#allocation6], %s1039_s0, %s1039_s0, %s1040_s20  }
  0x35   :  { %s1041_s15 = smov [#allocation8]   ;;  %s960_s21 = scalar_lea.hbm %s1303_s6, 64 }
  0x36   :  { %s66_s16 = sshll.u32 %s1041_s15, 4  ;;  %p961_p10 = scmp.ne.s32.totalorder %s1303_s6, %s960_s21  ;;  %s67_s16 = int_to_ptr.vmem [resolvable:$true] %s66_s16 }
  0x37   :  { %p964_p11 = scmp.lt.u32.totalorder %s960_s21, %s1303_s6 }
  0x39   :  { %p966_p12 = pnand %p964_p11, %p961_p10 }
  0x3b   :  { %969 = shalt.err (!%p966_p12)
}
  0x3c   :  { %s970_s25 = scalar_lea.vmem %s67_s16, 64  ;;  %p975_p0 = scmp.lt.s32.totalorder %s67_s16, %s67_s16 }
  0x3d   :  { %p971_p13 = scmp.ne.s32.totalorder %s67_s16, %s970_s25  ;;  %p976_p1 = scmp.lt.s32.totalorder %s970_s25, %s970_s25 }
  0x3f   :  { %p977_p2 = por %p976_p1, %p975_p0 }
  0x41   :  { %p978_p3 = pnand %p977_p2, %p971_p13 }
  0x43   :  { %981 = shalt.err (!%p978_p3)
}
  0x44   :  { %69 = dma.hbm_to_vmem [thread:$0]  %s1303_s6, 64, %s67_s16, [#allocation9]  }
  0x45   :  { %1026 = dma.done.wait [#allocation3], 128  }
  0x46   :  { %1027 = vsyncadd [#allocation3], 4294967168 }
  0x47   :  { %1028 = dma.done.wait [#allocation6], 256  }
  0x48   :  { %1029 = vsyncadd [#allocation6], 4294967040 }
  0x49   :  { %1030 = dma.done.wait [#allocation9], 64  }
  0x4a   :  { %1031 = vsyncadd [#allocation9], 4294967232  ;;  %v1042_v0 = vmov 0.0   ;;  %vm1043_vm0 = vmmov 0   ;;  %v873_v1 = vld [vmem:[#allocation7] sm:$0xff]   ;;  %v89_v2 = vld [vmem:[#allocation2] sm:$0xff] }
  0x4b   :  { %809 = vmatprep.subr.bf16.mxu0 %v1042_v0  ;;  %811 = vmatprep.mubr.msk.bf16.mxu0 %vm1043_vm0, %v1042_v0  ;;  %vm106_vm1 = vcmask 130048   ;;  %v90_v3 = vpack.c.bf16 %v89_v2, %v89_v2  ;;  %v874_v4 = vld [vmem:[%s1300_s3] sm:$0xff]   ;;  %v875_v5 = vld [vmem:[%s1300_s3 + $0x8] sm:$0xff]   ;;  %vm151_vm2 = vcmask 261120   ;;  %vm457_vm3 = vcmask 1043456   ;;  %s1044_s27 = smov 120  }
  0x4c   :  { %815 = vmatprep.subr.bf16.mxu1 %v1042_v0  ;;  %819 = vmatprep.mubr.msk.bf16.mxu1 %vm1043_vm0, %v1042_v0  ;;  %v757_v6 = vld [vmem:[%s1306_s9] ss:$0 sm:$0xff]  ;;  %v760_v35 = vld [vmem:[%s1306_s9 + $0x1] ss:$0 sm:$0xff]  ;;  %v761_v38 = vld [vmem:[%s1306_s9 + $0x2] ss:$0 sm:$0xff] }
  0x4d   :  { %810 = vmatpush3.bf16.msra.mxu0 %v873_v1  ;;  %816 = vmatpush3.bf16.msra.mxu1 %v874_v4  ;;  %v876_v42 = vld [vmem:[%s1301_s4] sm:$0xff]   ;;  %v877_v43 = vld [vmem:[%s1301_s4 + $0x8] sm:$0xff]   ;;  %s1045_s28 = smov 8   ;;  %vm453_vm4 = vcmask 64512   ;;  %vm724_vm5 = vcmask 195584   ;;  %s1046_s25 = smov [#allocation11]  }
  0x4e   :  { %823 = vmatprep.subr.bf16.mxu0 %v1042_v0  ;;  %817 = vmatprep.subr.bf16.mxu1 %v1042_v0  ;;  %v878_v44 = vld [vmem:[%s1302_s5] sm:$0xff]   ;;  %s742_s2 = sshll.u32 %s1046_s25, 4  ;;  %s743_s2 = int_to_ptr.vmem [resolvable:$true] %s742_s2 }
  0x4f   :  { %v762_v45 = vld [vmem:[%s1306_s9 + $0x3] ss:$0 sm:$0xff]  ;;  %s982_s23 = scalar_lea.vmem %s743_s2, 128  ;;  %p987_p5 = scmp.lt.s32.totalorder %s743_s2, %s743_s2 }
  0x50   :  { %812 = vmatmul.mubr.msk.bf16.vlgmr.msra.gmra.mrb[0].mxu0 %vm106_vm1, %v90_v3  ;;  %p983_p4 = scmp.ne.s32.totalorder %s743_s2, %s982_s23  ;;  %p988_p6 = scmp.lt.s32.totalorder %s982_s23, %s982_s23 }
  0x51   :  { %827 = vmatprep.mubr.msk.bf16.mxu0 %vm1043_vm0, %v1042_v0  ;;  %818 = vmatpush3.bf16.msra.mxu1 %v875_v5 }
  0x52   :  { %831 = vmatprep.subr.bf16.mxu1 %v1042_v0  ;;  %824 = vmatpush3.bf16.msra.mxu0 %v876_v42  ;;  %p989_p7 = por %p988_p6, %p987_p5 }
  0x53   :  { %825 = vmatprep.subr.bf16.mxu0 %v1042_v0 }
  0x54   :  { %p990_p8 = pnand %p989_p7, %p983_p4 }
  0x56   :  { %826 = vmatpush3.bf16.msra.mxu0 %v877_v43 }
  0x57   :  { %839 = vmatprep.subr.bf16.mxu0 %v1042_v0 }
 0x123   :  { %v144_v7 = vpop.f32.mrb[0].mxu0 }
 0x124   :  { %v145_v8 = vadd.f32 %v757_v6, %v144_v7  ;;  %v813_v9 = vpop.f32.mrb[1].mxu0 }
 0x125   :  { %v147_v10 = vpop.f32.mrb[2].mxu0 }
 0x126   :  { %v150_v11 = vmax.f32 %v145_v8, 0.0  ;;  %v814_v12 = vpop.f32.mrb[3].mxu0  ;;  %v766_v10 = vld [vmem:[%s1306_s9 + $0x4] ss:$0 sm:$0xff] }
 0x128   :  { %v152_v13 = vsel %vm151_vm2, %v150_v11, 0.0  ;;  %v159_v14 = vmul.f32 %v150_v11, %v150_v11 }
 0x129   :  { %v153_v15 = vrot.slane %v152_v13, 4 }
 0x12a   :  { %v160_v16 = vsel %vm151_vm2, %v159_v14, 0.0 }
 0x12b   :  { %v154_v17 = vadd.f32 %v153_v15, %v152_v13  ;;  %v161_v18 = vrot.slane %v160_v16, 4  ;;  %v767_v13 = vld [vmem:[%s1306_s9 + $0x5] ss:$0 sm:$0xff] }
 0x12d   :  { %v155_v19 = vrot.slane %v154_v17, 2  ;;  %v162_v20 = vadd.f32 %v161_v18, %v160_v16  ;;  %v879_v18 = vld [vmem:[%s1302_s5 + $0x8] sm:$0xff]  }
 0x12f   :  { %v156_v21 = vadd.f32 %v155_v19, %v154_v17  ;;  %v163_v22 = vrot.slane %v162_v20, 2  ;;  %v768_v19 = vld [vmem:[%s1306_s9 + $0x6] ss:$0 sm:$0xff] }
 0x131   :  { %v157_v23 = vrot.slane %v156_v21, 1  ;;  %v164_v24 = vadd.f32 %v163_v22, %v162_v20 }
 0x133   :  { %v158_v25 = vadd.f32 %v157_v23, %v156_v21  ;;  %v165_v26 = vrot.slane %v164_v24, 1 }
 0x135   :  { %v166_v27 = vadd.f32 %v165_v26, %v164_v24  ;;  %v167_v28 = vmul.f32 0.125, %v158_v25  ;;  %v445_v26 = vld [vmem:[#allocation8] sm:$0xf] }
 0x137   :  { %v168_v29 = vmul.f32 0.125, %v166_v27  ;;  %v169_v30 = vmul.f32 %v167_v28, %v167_v28  ;;  %v173_v34 = vsub.f32 %v150_v11, %v167_v28  ;;  %v459_v27 = vsel %vm457_vm3, %v445_v26, 0  ;;  %v772_v28 = vld [vmem:[%s1306_s9 + $0x7] ss:$0 sm:$0xff] }
 0x139   :  { %v170_v31 = vsub.f32 %v168_v29, %v169_v30  ;;  %v180_v36 = vmul.f32 %v760_v35, %v173_v34 }
 0x13b   :  { %v171_v32 = vmax.f32 %v170_v31, 0.0 }
 0x13d   :  { %v181_v33 = vadd.f32 1e-05, %v171_v32 }
 0x13f   :  { %884 = vrsqrt.f32 %v181_v33 }
 0x149   :  { %v885_v37 = vpop.eup %884 }
 0x14a   :  { %v183_v39 = vmul.f32 %v885_v37, %v180_v36  ;;  %v437_v37 = vld [vmem:[#allocation5] sm:$0xff] }
 0x14c   :  { %v191_v40 = vadd.f32 %v761_v38, %v183_v39 }
 0x14e   :  { %v192_v41 = vpack.c.bf16 %v191_v40, %v191_v40 }
 0x150   :  { %820 = vmatmul.mubr.msk.bf16.vlgmr.msra.gmra.mrb[0].mxu1 %vm151_vm2, %v192_v41 }
 0x151   :  { %835 = vmatprep.mubr.msk.bf16.mxu1 %vm1043_vm0, %v1042_v0  ;;  %832 = vmatpush3.bf16.msra.mxu1 %v878_v44 }
 0x152   :  { %833 = vmatprep.subr.bf16.mxu1 %v1042_v0 }
 0x155   :  { %834 = vmatpush3.bf16.msra.mxu1 %v879_v18 }
 0x156   :  { %845 = vmatprep.subr.bf16.mxu1 %v1042_v0 }
 0x223   :  { %v253_v46 = vpop.f32.mrb[0].mxu1 }
 0x224   :  { %v254_v47 = vadd.f32 %v762_v45, %v253_v46  ;;  %v821_v48 = vpop.f32.mrb[1].mxu1  ;;  %v880_v45 = vld [vmem:[%s1304_s7] sm:$0xff]   ;;  %v881_v46 = vld [vmem:[%s1304_s7 + $0x8] sm:$0xff]  }
 0x225   :  { %v256_v49 = vpop.f32.mrb[2].mxu1 }
 0x226   :  { %v259_v50 = vsel %vm151_vm2, %v254_v47, 0.0  ;;  %v266_v51 = vmul.f32 %v254_v47, %v254_v47  ;;  %v822_v52 = vpop.f32.mrb[3].mxu1 }
 0x227   :  { %v260_v53 = vrot.slane %v259_v50, 4 }
 0x228   :  { %v267_v54 = vsel %vm151_vm2, %v266_v51, 0.0 }
 0x229   :  { %v261_v55 = vadd.f32 %v260_v53, %v259_v50  ;;  %v268_v56 = vrot.slane %v267_v54, 4 }
 0x22b   :  { %v262_v57 = vrot.slane %v261_v55, 2  ;;  %v269_v58 = vadd.f32 %v268_v56, %v267_v54 }
 0x22d   :  { %v263_v59 = vadd.f32 %v262_v57, %v261_v55  ;;  %v270_v60 = vrot.slane %v269_v58, 2 }
 0x22f   :  { %v264_v61 = vrot.slane %v263_v59, 1  ;;  %v271_v62 = vadd.f32 %v270_v60, %v269_v58 }
 0x231   :  { %v265_v63 = vadd.f32 %v264_v61, %v263_v59  ;;  %v272_v1 = vrot.slane %v271_v62, 1 }
 0x233   :  { %v273_v2 = vadd.f32 %v272_v1, %v271_v62  ;;  %v274_v3 = vmul.f32 0.125, %v265_v63 }
 0x235   :  { %v275_v4 = vmul.f32 0.125, %v273_v2  ;;  %v276_v5 = vmul.f32 %v274_v3, %v274_v3  ;;  %v280_v9 = vsub.f32 %v254_v47, %v274_v3  ;;  %v776_v47 = vld [vmem:[%s1306_s9 + $0x8] ss:$0 sm:$0xff] }
 0x237   :  { %v277_v6 = vsub.f32 %v275_v4, %v276_v5  ;;  %v287_v11 = vmul.f32 %v766_v10, %v280_v9 }
 0x239   :  { %v278_v7 = vmax.f32 %v277_v6, 0.0 }
 0x23b   :  { %v288_v8 = vadd.f32 1e-05, %v278_v7 }
 0x23d   :  { %886 = vrsqrt.f32 %v288_v8 }
 0x247   :  { %v887_v12 = vpop.eup %886 }
 0x248   :  { %v290_v14 = vmul.f32 %v887_v12, %v287_v11 }
 0x24a   :  { %v298_v15 = vadd.f32 %v767_v13, %v290_v14  ;;  %v778_v13 = vld [vmem:[%s1306_s9 + $0x9] ss:$0 sm:$0xff] }
 0x24c   :  { %v299_v16 = vmax.f32 %v298_v15, 0.0 }
 0x24e   :  { %v300_v17 = vpack.c.bf16 %v299_v16, %v299_v16  ;;  %v779_v16 = vld [vmem:[%s1306_s9 + $0xa] ss:$0 sm:$0xff] }
 0x250   :  { %828 = vmatmul.mubr.msk.bf16.vlgmr.msra.gmra.mrb[4].mxu0 %vm151_vm2, %v300_v17 }
 0x251   :  { %841 = vmatprep.mubr.msk.bf16.mxu0 %vm1043_vm0, %v1042_v0  ;;  %840 = vmatpush3.bf16.msra.mxu0 %v459_v27 }
 0x252   :  { %853 = vmatprep.subr.bf16.mxu0 %v1042_v0 }
 0x323   :  { %v361_v20 = vpop.f32.mrb[4].mxu0 }
 0x324   :  { %v362_v21 = vadd.f32 %v768_v19, %v361_v20  ;;  %v829_v22 = vpop.f32.mrb[5].mxu0  ;;  %v882_v20 = vld [vmem:[%s1305_s8] sm:$0xff]  }
 0x325   :  { %v364_v23 = vpop.f32.mrb[6].mxu0  ;;  %v780_v22 = vld [vmem:[%s1306_s9 + $0xb] ss:$0 sm:$0xff] }
 0x326   :  { %v367_v24 = vpack.c.bf16 %v362_v21, %v362_v21  ;;  %v830_v25 = vpop.f32.mrb[7].mxu0  ;;  %v883_v21 = vld [vmem:[%s1305_s8 + $0x8] sm:$0xff]  }
 0x328   :  { %836 = vmatmul.mubr.msk.bf16.vlgmr.msra.gmra.mrb[4].mxu1 %vm151_vm2, %v367_v24 }
 0x329   :  { %849 = vmatprep.mubr.msk.bf16.mxu1 %vm1043_vm0, %v1042_v0  ;;  %846 = vmatpush3.bf16.msra.mxu1 %v880_v45 }
 0x32a   :  { %847 = vmatprep.subr.bf16.mxu1 %v1042_v0 }
 0x32d   :  { %848 = vmatpush3.bf16.msra.mxu1 %v881_v46 }
 0x3fb   :  { %v428_v29 = vpop.f32.mrb[4].mxu1 }
 0x3fc   :  { %v429_v30 = vadd.f32 %v772_v28, %v428_v29  ;;  %v837_v31 = vpop.f32.mrb[5].mxu1 }
 0x3fd   :  { %v431_v32 = vpop.f32.mrb[6].mxu1 }
 0x3fe   :  { %v434_v33 = vmul.f32 0.5, %v429_v30  ;;  %v838_v34 = vpop.f32.mrb[7].mxu1 }
 0x400   :  { %v435_v35 = vmul.f32 1.442695, %v434_v33 }
 0x402   :  { %888 = vpow2.f32 %v435_v35 }
 0x40c   :  { %v889_v36 = vpop.eup %888 }
 0x40d   :  { %439 = vrot.lane.b32.xlu0 %v889_v36, %s1044_s27 }
 0x411   :  { %719 = vrot.lane.b32.xlu0 %v429_v30, %s1045_s28 }
 0x47f   :  { %v440_v38 = vpop.permute.xlu0 %439 }
 0x480   :  { %v442_v39 = vmul.f32 %v440_v38, %v437_v37 }
 0x482   :  { %v443_v40 = vadd.f32 %v442_v39, %v429_v30 }
 0x483   :  { %v720_v41 = vpop.permute.xlu0 %719 }
 0x484   :  { %v444_v42 = vpack.c.bf16 %v443_v40, %v443_v40  ;;  %v722_v43 = vsel %vm453_vm4, %v443_v40, %v720_v41 }
 0x485   :  { %v723_v44 = vsel %vm106_vm1, %v722_v43, %v720_v41 }
 0x486   :  { %842 = vmatmul.mubr.msk.bf16.vlgmr.msra.gmra.mrb[8].mxu0 %vm453_vm4, %v444_v42  ;;  %725 = vst.msk [vmem:[#allocation11] sm:$0xff] %vm724_vm5, %v723_v44 }
 0x487   :  { %857 = vmatprep.mubr.msk.bf16.mxu0 %vm1043_vm0, %v1042_v0  ;;  %854 = vmatpush3.bf16.msra.mxu0 %v882_v20 }
 0x488   :  { %855 = vmatprep.subr.bf16.mxu0 %v1042_v0 }
 0x48b   :  { %856 = vmatpush3.bf16.msra.mxu0 %v883_v21 }
 0x559   :  { %v495_v48 = vpop.f32.mrb[8].mxu0 }
 0x55a   :  { %v496_v49 = vadd.f32 %v776_v47, %v495_v48  ;;  %v843_v50 = vpop.f32.mrb[9].mxu0 }
 0x55b   :  { %v498_v51 = vpop.f32.mrb[10].mxu0 }
 0x55c   :  { %v501_v52 = vmax.f32 %v496_v49, 0.0  ;;  %v844_v53 = vpop.f32.mrb[11].mxu0  ;;  %v784_v49 = vld [vmem:[%s1306_s9 + $0xc] ss:$0 sm:$0xff] }
 0x55e   :  { %v502_v54 = vsel %vm151_vm2, %v501_v52, 0.0  ;;  %v509_v55 = vmul.f32 %v501_v52, %v501_v52 }
 0x55f   :  { %v503_v56 = vrot.slane %v502_v54, 4 }
 0x560   :  { %v510_v57 = vsel %vm151_vm2, %v509_v55, 0.0 }
 0x561   :  { %v504_v58 = vadd.f32 %v503_v56, %v502_v54  ;;  %v511_v59 = vrot.slane %v510_v57, 4 }
 0x563   :  { %v505_v60 = vrot.slane %v504_v58, 2  ;;  %v512_v61 = vadd.f32 %v511_v59, %v510_v57 }
 0x565   :  { %v506_v62 = vadd.f32 %v505_v60, %v504_v58  ;;  %v513_v63 = vrot.slane %v512_v61, 2 }
 0x567   :  { %v507_v1 = vrot.slane %v506_v62, 1  ;;  %v514_v2 = vadd.f32 %v513_v63, %v512_v61 }
 0x569   :  { %v508_v3 = vadd.f32 %v507_v1, %v506_v62  ;;  %v515_v4 = vrot.slane %v514_v2, 1 }
 0x56b   :  { %v516_v5 = vadd.f32 %v515_v4, %v514_v2  ;;  %v517_v6 = vmul.f32 0.125, %v508_v3 }
 0x56d   :  { %v518_v7 = vmul.f32 0.125, %v516_v5  ;;  %v519_v8 = vmul.f32 %v517_v6, %v517_v6  ;;  %v523_v12 = vsub.f32 %v501_v52, %v517_v6  ;;  %v785_v52 = vld [vmem:[%s1306_s9 + $0xd] ss:$0 sm:$0xff] }
 0x56f   :  { %v520_v9 = vsub.f32 %v518_v7, %v519_v8  ;;  %v530_v14 = vmul.f32 %v778_v13, %v523_v12 }
 0x571   :  { %v521_v10 = vmax.f32 %v520_v9, 0.0 }
 0x573   :  { %v531_v11 = vadd.f32 1e-05, %v521_v10 }
 0x575   :  { %890 = vrsqrt.f32 %v531_v11 }
 0x57f   :  { %v891_v15 = vpop.eup %890 }
 0x580   :  { %v533_v17 = vmul.f32 %v891_v15, %v530_v14 }
 0x582   :  { %v541_v18 = vadd.f32 %v779_v16, %v533_v17 }
 0x584   :  { %v542_v19 = vpack.c.bf16 %v541_v18, %v541_v18 }
 0x586   :  { %850 = vmatmul.mubr.msk.bf16.vlgmr.msra.gmra.mrb[8].mxu1 %vm151_vm2, %v542_v19 }
 0x659   :  { %v603_v23 = vpop.f32.mrb[8].mxu1 }
 0x65a   :  { %v604_v24 = vadd.f32 %v780_v22, %v603_v23  ;;  %v851_v25 = vpop.f32.mrb[9].mxu1 }
 0x65b   :  { %v606_v26 = vpop.f32.mrb[10].mxu1 }
 0x65c   :  { %v609_v27 = vsel %vm151_vm2, %v604_v24, 0.0  ;;  %v616_v28 = vmul.f32 %v604_v24, %v604_v24  ;;  %v852_v29 = vpop.f32.mrb[11].mxu1 }
 0x65d   :  { %v610_v30 = vrot.slane %v609_v27, 4 }
 0x65e   :  { %v617_v0 = vsel %vm151_vm2, %v616_v28, 0.0 }
 0x65f   :  { %v611_v31 = vadd.f32 %v610_v30, %v609_v27  ;;  %v618_v32 = vrot.slane %v617_v0, 4 }
 0x661   :  { %v612_v33 = vrot.slane %v611_v31, 2  ;;  %v619_v34 = vadd.f32 %v618_v32, %v617_v0 }
 0x663   :  { %v613_v35 = vadd.f32 %v612_v33, %v611_v31  ;;  %v620_v36 = vrot.slane %v619_v34, 2 }
 0x665   :  { %v614_v37 = vrot.slane %v613_v35, 1  ;;  %v621_v38 = vadd.f32 %v620_v36, %v619_v34 }
 0x667   :  { %v615_v39 = vadd.f32 %v614_v37, %v613_v35  ;;  %v622_v40 = vrot.slane %v621_v38, 1 }
 0x669   :  { %v623_v41 = vadd.f32 %v622_v40, %v621_v38  ;;  %v624_v42 = vmul.f32 0.125, %v615_v39 }
 0x66b   :  { %v625_v43 = vmul.f32 0.125, %v623_v41  ;;  %v626_v44 = vmul.f32 %v624_v42, %v624_v42  ;;  %v630_v48 = vsub.f32 %v604_v24, %v624_v42 }
 0x66d   :  { %v627_v45 = vsub.f32 %v625_v43, %v626_v44  ;;  %v637_v50 = vmul.f32 %v784_v49, %v630_v48 }
 0x66f   :  { %v628_v46 = vmax.f32 %v627_v45, 0.0 }
 0x671   :  { %v638_v47 = vadd.f32 1e-05, %v628_v46 }
 0x673   :  { %892 = vrsqrt.f32 %v638_v47 }
 0x67d   :  { %v893_v51 = vpop.eup %892 }
 0x67e   :  { %v640_v53 = vmul.f32 %v893_v51, %v637_v50 }
 0x680   :  { %v648_v54 = vadd.f32 %v785_v52, %v640_v53 }
 0x682   :  { %v649_v55 = vmax.f32 %v648_v54, 0.0 }
 0x684   :  { %v650_v56 = vpack.c.bf16 %v649_v55, %v649_v55 }
 0x686   :  { %858 = vmatmul.mubr.msk.bf16.vlgmr.msra.gmra.mrb[12].mxu0 %vm151_vm2, %v650_v56 }
 0x687   :  { %993 = shalt.err (!%p990_p8)
}
 0x688   :  { %s994_s26 = scalar_lea.hbm %s1308_s11, 128 }
 0x689   :  { %p995_p9 = scmp.ne.s32.totalorder %s1308_s11, %s994_s26  ;;  %p998_p10 = scmp.lt.u32.totalorder %s994_s26, %s1308_s11 }
 0x68b   :  { %p1000_p11 = pnand %p998_p10, %p995_p9 }
 0x68d   :  { %1003 = shalt.err (!%p1000_p11)
}
 0x68e   :  { %745 = dma.vmem_to_hbm [thread:$0]  %s743_s2, 128, %s1308_s11, [#allocation12]   ;;  %v786_v57 = vld [vmem:[%s1306_s9 + $0xe] ss:$0 sm:$0xff] }
 0x68f   :  { %s1047_s7 = smov [#allocation10]  }
 0x690   :  { %s732_s13 = sshll.u32 %s1047_s7, 4  ;;  %s733_s13 = int_to_ptr.vmem [resolvable:$true] %s732_s13 }
 0x691   :  { %s1004_s14 = scalar_lea.vmem %s733_s13, 128  ;;  %p1009_p13 = scmp.lt.s32.totalorder %s733_s13, %s733_s13 }
 0x692   :  { %p1005_p12 = scmp.ne.s32.totalorder %s733_s13, %s1004_s14  ;;  %p1010_p0 = scmp.lt.s32.totalorder %s1004_s14, %s1004_s14 }
 0x694   :  { %p1011_p1 = por %p1010_p0, %p1009_p13 }
 0x696   :  { %p1012_p2 = pnand %p1011_p1, %p1005_p12 }
 0x759   :  { %v711_v58 = vpop.f32.mrb[12].mxu0 }
 0x75a   :  { %v712_v59 = vadd.f32 %v786_v57, %v711_v58  ;;  %v859_v60 = vpop.f32.mrb[13].mxu0 }
 0x75b   :  { %v714_v61 = vpop.f32.mrb[14].mxu0 }
 0x75c   :  { %717 = vst.msk [vmem:[#allocation10] sm:$0xff] %vm106_vm1, %v712_v59  ;;  %v860_v62 = vpop.f32.mrb[15].mxu0 }
 0x75d   :  { %1015 = shalt.err (!%p1012_p2)
}
 0x75e   :  { %s1016_s9 = scalar_lea.hbm %s1307_s10, 128 }
 0x75f   :  { %p1017_p3 = scmp.ne.s32.totalorder %s1307_s10, %s1016_s9  ;;  %p1020_p4 = scmp.lt.u32.totalorder %s1016_s9, %s1307_s10 }
 0x761   :  { %p1022_p5 = pnand %p1020_p4, %p1017_p3 }
 0x763   :  { %1025 = shalt.err (!%p1022_p5)
}
 0x764   :  { %735 = dma.vmem_to_hbm [thread:$0]  %s733_s13, 128, %s1307_s10, [#allocation4]  }
 0x765   :  { %1032 = dma.done.wait [#allocation4], 128  }
 0x766   :  { %1033 = vsyncadd [#allocation4], 4294967168 }
 0x767   :  { %1034 = dma.done.wait [#allocation12], 128  }
 0x768   :  { %1035 = vsyncadd [#allocation12], 4294967168 }
 0x769   :  { %752 = vsyncpa [#allocation3], 1 }
 0x76a   :  { %753 = vsyncpa [#allocation6], 1 }
 0x76b   :  { %754 = vsyncpa [#allocation9], 1 }
 0x76c   :  { %755 = vsyncpa [#allocation4], 1 }
 0x76d   :  { %756 = vsyncpa [#allocation12], 1 }

</bundles_post_ra>
